<compile_context>
chip_gen: v5e
topology: v5e:2x2
jax: 0.10.0
libtpu: 0.0.40
codegen_flags: <defaults>
</compile_context>

<pallas_src>
import math

import jax
import jax.numpy as jnp
from jax.experimental import pallas as pl
from jax.experimental.pallas import tpu as pltpu


def vq_kernel(x_ref, cb_ref, cb_sqr_ref, idx_ref):
    """One row-tile -> nearest-codebook indices (lane-dense).

    x_ref:      (TN, D)  input vectors tile (native dtype, fed to MXU as-is)
    cb_ref:     (K, D)   full codebook (resident: constant index_map)
    cb_sqr_ref: (K, 1)   precomputed ||codebook_k||^2 (hoisted to wrapper)
    idx_ref:    (1, TN)  int32 nearest-codebook indices
    """
    x = x_ref[...]
    cb = cb_ref[...]
    K = cb.shape[0]

    # Cross term on the MXU, transposed layout: contract D of both operands
    # -> (K, TN) with TN on the lane axis.  No explicit transpose needed.
    dots = jax.lax.dot_general(
        cb, x, (((1,), (1,)), ((), ())),
        preferred_element_type=jnp.float32)                  # (K, TN) f32

    # ||x_i||^2 is constant over k -> cannot change the argmin -> dropped.
    dist = cb_sqr_ref[...] - 2.0 * dots                      # (K, TN) f32

    # argmin over K (sublane axis), first-index tie-break (matches torch.min).
    min_d = jnp.min(dist, axis=0, keepdims=True)                   # (1, TN)
    sub_ids = jax.lax.broadcasted_iota(jnp.int32, dist.shape, 0)   # (K, TN)
    idx = jnp.min(jnp.where(dist == min_d, sub_ids, K),
                  axis=0, keepdims=True)                           # (1, TN)

    idx_ref[...] = idx.astype(jnp.int32)


def _round_up(n, m):
    return ((n + m - 1) // m) * m


def env_embedding_forward(x, codebook, *, tile_n=1024):
    """Pallas implementation of EnvEmbedding.forward.

    x:        (..., D) float array
    codebook: (K, D)   embedding weight
    returns:  (...)    int32 indices of nearest codebook entries
    """
    *lead, D = x.shape
    N = math.prod(lead) if lead else 1
    K = codebook.shape[0]

    # Lane-dense tiles: tile_n must be a multiple of 128; clamp so tiny inputs
    # (like the demo) don't over-pad.  For large N keep tile_n moderate enough
    # that the grid has several steps (lets v7x shard the "parallel" axis
    # across its 2 TensorCores).
    tile_n = max(128, _round_up(int(tile_n), 128))
    tile_n = min(tile_n, _round_up(N, 128))

    num_tiles = pl.cdiv(N, tile_n)
    n_pad = num_tiles * tile_n

    x_flat = x.reshape(N, D)
    if n_pad != N:
        # Ragged tail: pad with zeros; padded rows' indices are discarded below.
        x_flat = jnp.pad(x_flat, ((0, n_pad - N), (0, 0)))

    # Hoisted once out of the per-tile loop (was recomputed every grid step).
    cb_f32 = codebook.astype(jnp.float32)
    cb_sqr = jnp.sum(cb_f32 * cb_f32, axis=1, keepdims=True)        # (K, 1)

    out = pl.pallas_call(
        vq_kernel,
        out_shape=jax.ShapeDtypeStruct((num_tiles, tile_n), jnp.int32),
        grid_spec=pltpu.PrefetchScalarGridSpec(
            num_scalar_prefetch=0,
            grid=(num_tiles,),
            in_specs=[
                pl.BlockSpec((tile_n, D), lambda i: (i, 0)),   # row tile of x
                pl.BlockSpec((K, D), lambda i: (0, 0)),        # full codebook
                pl.BlockSpec((K, 1), lambda i: (0, 0)),        # ||cb_k||^2
            ],
            out_specs=pl.BlockSpec((1, tile_n), lambda i: (i, 0)),  # lane-dense
        ),
        compiler_params=pltpu.CompilerParams(
            dimension_semantics=("parallel",),
        ),
    )(x_flat, codebook, cb_sqr)

    idx = out.reshape(n_pad)[:N]
    return idx.reshape(*lead) if lead else idx.reshape(())


def reference_forward(x, codebook):
    """Pure-JAX reference mirroring the PyTorch vq() semantics."""
    *lead, D = x.shape
    xf = x.reshape(-1, D).astype(jnp.float32)
    cb = codebook.astype(jnp.float32)
    dist = (jnp.sum(cb * cb, axis=1)[None, :]
            + jnp.sum(xf * xf, axis=1, keepdims=True)
            - 2.0 * xf @ cb.T)
    return jnp.argmin(dist, axis=1).astype(jnp.int32).reshape(*lead)


if __name__ == "__main__":
    # Module hyperparameters: K codebook entries of dimension D.
    K, D = 16, 32
    batch, seq = 2, 8          # x: (batch, seq, D) -> indices (batch, seq)

    key = jax.random.PRNGKey(0)
    k_emb, k_x = jax.random.split(key)

    # nn.Embedding(K, D) with uniform_(-1/K, 1/K) init (deterministic here).
    embedding_weight = jax.random.uniform(
        k_emb, (K, D), minval=-1.0 / K, maxval=1.0 / K, dtype=jnp.float32)

    x = jax.random.normal(k_x, (batch, seq, D), dtype=jnp.float32)

    latents = env_embedding_forward(x, embedding_weight)
    latents = jax.block_until_ready(latents)

    # Sanity check against the pure-JAX reference.
    ref = reference_forward(x, embedding_weight)
    assert latents.shape == (batch, seq)
    assert bool(jnp.all(latents == ref)), "mismatch vs reference"

    print("KERNEL_OK")
</pallas_src>

<mosaic_0001>
module attributes {stable_mosaic.version = 11 : i64} {
  func.func @vq_kernel(%arg0: i32, %arg1: memref<128x32xf32, #tpu.memory_space<vmem>>, %arg2: memref<16x32xf32, #tpu.memory_space<vmem>>, %arg3: memref<16x1xf32, #tpu.memory_space<vmem>>, %arg4: memref<1x128xi32, #tpu.memory_space<vmem>>) attributes {dimension_semantics = [#tpu.dimension_semantics<parallel>], iteration_bounds = array<i64: 1>, scalar_prefetch = 0 : i64, scratch_operands = 0 : i64, tpu.core_type = #tpu.core_type<tc>, window_params = [{transform_indices = @transform_0, window_bounds = array<i64: 128, 32>}, {pipeline_mode = #tpu.pipeline_mode<synchronous>, transform_indices = @transform_1, window_bounds = array<i64: 16, 32>}, {pipeline_mode = #tpu.pipeline_mode<synchronous>, transform_indices = @transform_2, window_bounds = array<i64: 16, 1>}, {transform_indices = @transform_3, window_bounds = array<i64: 1, 128>}]} {
    %c0 = arith.constant 0 : index
    %c0_0 = arith.constant 0 : index
    %0 = vector.load %arg1[%c0, %c0_0] : memref<128x32xf32, #tpu.memory_space<vmem>>, vector<128x32xf32>
    %c0_1 = arith.constant 0 : index
    %c0_2 = arith.constant 0 : index
    %1 = vector.load %arg2[%c0_1, %c0_2] : memref<16x32xf32, #tpu.memory_space<vmem>>, vector<16x32xf32>
    %cst = arith.constant dense<0.000000e+00> : vector<16x128xf32>
    %2 = tpu.matmul %1, %0, %cst {dimension_numbers = #tpu.dot_dimension_numbers<[1], [1], [0], [0], [0, 0, 1, 0], [], []>} : vector<16x32xf32>, vector<128x32xf32>, vector<16x128xf32> -> vector<16x128xf32>
    %c0_3 = arith.constant 0 : index
    %c0_4 = arith.constant 0 : index
    %3 = vector.load %arg3[%c0_3, %c0_4] : memref<16x1xf32, #tpu.memory_space<vmem>>, vector<16x1xf32>
    %cst_5 = arith.constant 2.000000e+00 : f32
    %4 = vector.broadcast %cst_5 : f32 to vector<16x128xf32>
    %5 = arith.mulf %4, %2 : vector<16x128xf32>
    %6 = vector.broadcast %3 : vector<16x1xf32> to vector<16x128xf32>
    %7 = arith.subf %6, %5 : vector<16x128xf32>
    %cst_6 = arith.constant dense<0x7F800000> : vector<128xf32>
    %8 = vector.multi_reduction <minimumf>, %7, %cst_6 [0] : vector<16x128xf32> to vector<128xf32>
    %9 = vector.shape_cast %8 : vector<128xf32> to vector<1x128xf32>
    %10 = tpu.iota {dimensions = array<i32: 0>} : vector<16x128xi32>
    %11 = vector.broadcast %9 : vector<1x128xf32> to vector<16x128xf32>
    %12 = arith.cmpf oeq, %7, %11 : vector<16x128xf32>
    %c16_i32 = arith.constant 16 : i32
    %13 = vector.broadcast %c16_i32 : i32 to vector<16x128xi32>
    %14 = arith.select %12, %10, %13 : vector<16x128xi1>, vector<16x128xi32>
    %cst_7 = arith.constant dense<2147483647> : vector<128xi32>
    %15 = vector.multi_reduction <minsi>, %14, %cst_7 [0] : vector<16x128xi32> to vector<128xi32>
    %16 = vector.shape_cast %15 : vector<128xi32> to vector<1x128xi32>
    %c0_8 = arith.constant 0 : index
    %c0_9 = arith.constant 0 : index
    %17 = vector.load %arg4[%c0_8, %c0_9] : memref<1x128xi32, #tpu.memory_space<vmem>>, vector<1x128xi32>
    tpu.vector_store %arg4[%c0_8, %c0_9], %16 {strides = array<i32>} : memref<1x128xi32, #tpu.memory_space<vmem>>, vector<1x128xi32>,
    return
  }
  func.func @transform_0(%arg0: i32) -> (i32, i32) {
    %c0_i32 = arith.constant 0 : i32
    %c0_i32_0 = arith.constant 0 : i32
    return %arg0, %c0_i32 : i32, i32
  }
  func.func @transform_1(%arg0: i32) -> (i32, i32) {
    %c0_i32 = arith.constant 0 : i32
    %c0_i32_0 = arith.constant 0 : i32
    %c0_i32_1 = arith.constant 0 : i32
    return %c0_i32, %c0_i32_0 : i32, i32
  }
  func.func @transform_2(%arg0: i32) -> (i32, i32) {
    %c0_i32 = arith.constant 0 : i32
    %c0_i32_0 = arith.constant 0 : i32
    %c0_i32_1 = arith.constant 0 : i32
    return %c0_i32, %c0_i32_0 : i32, i32
  }
  func.func @transform_3(%arg0: i32) -> (i32, i32) {
    %c0_i32 = arith.constant 0 : i32
    %c0_i32_0 = arith.constant 0 : i32
    return %arg0, %c0_i32 : i32, i32
  }
}

</mosaic_0001>

<bundles_post_ra>
// kernel: tpu_custom_call.1
= control target key start
LH: loop header
LB: loop body
LE: loop exit
PB: predicated region body
PF: predicated region fallthrough
CT: control target
= control target key end

     0   :  { %vm33_vm0 = vcmask 261120   ;;  %s351_s0 = inlined_call_operand.vmem [shape: f32[128,32], index: 0, kind: input, shape index: {}]   ;;  %s352_s1 = inlined_call_operand.vmem [shape: f32[16,32], index: 1, kind: input, shape index: {}]   ;;  %s353_s2 = inlined_call_operand.vmem [shape: f32[16,1], index: 2, kind: input, shape index: {}]   ;;  %s354_s3 = inlined_call_operand.hbm [shape: s32[1,128], index: 3, kind: output, shape index: {}]  }
   0x1   :  { %v30_v0 = vld [vmem:[%s351_s0 + $0x78] sm:$0xff]  ;;  %v29_v1 = vld [vmem:[%s351_s0 + $0x70] sm:$0xff] }
   0x2   :  { %169 = vmatpush.xpose.msk.msra.mxu0 %vm33_vm0, %v30_v0  ;;  %187 = vmatpush.xpose.msk.msra.mxu1 %vm33_vm0, %v30_v0 }
   0x3   :  { %8 = vsyncpa [#allocation3], 0  ;;  %v28_v2 = vld [vmem:[%s351_s0 + $0x68] sm:$0xff]  ;;  %v27_v3 = vld [vmem:[%s351_s0 + $0x60] sm:$0xff]  ;;  %v232_v9 = vmov 0   ;;  %v134_v31 = vlaneseq  ;;  %s160_s26 = sshll.u32 %s354_s3, 4  ;;  %s161_s26 = int_to_ptr.hbm [resolvable:$true] %s160_s26 }
   0x4   :  { %v26_v4 = vld [vmem:[%s351_s0 + $0x58] sm:$0xff]  ;;  %v25_v5 = vld [vmem:[%s351_s0 + $0x50] sm:$0xff]  ;;  %v24_v6 = vld [vmem:[%s351_s0 + $0x48] sm:$0xff]  ;;  %205 = vset.pattern.permute.xlu0 %v232_v9 }
   0x5   :  { %v111_v7 = vld [vmem:[%s353_s2] sm:$0xff]  ;;  %v22_v10 = vld [vmem:[%s351_s0 + $0x38] sm:$0xff]  ;;  %v112_v11 = vld [vmem:[%s353_s2 + $0x8] sm:$0xff]  ;;  %v135_v34 = vshrl.u32 %v134_v31, 7 }
   0x6   :  { %170 = vmatpush.xpose.msk.msra.mxu0 %vm33_vm0, %v29_v1  ;;  %188 = vmatpush.xpose.msk.msra.mxu1 %vm33_vm0, %v29_v1  ;;  %v23_v8 = vld [vmem:[%s351_s0 + $0x40] sm:$0xff]  ;;  %v21_v12 = vld [vmem:[%s351_s0 + $0x30] sm:$0xff]  ;;  %v20_v13 = vld [vmem:[%s351_s0 + $0x28] sm:$0xff] }
   0x7   :  { %117 = vperm.xlu0 %205, %v111_v7   ;;  %v19_v14 = vld [vmem:[%s351_s0 + $0x20] sm:$0xff]  ;;  %v18_v15 = vld [vmem:[%s351_s0 + $0x18] sm:$0xff]  ;;  %v17_v16 = vld [vmem:[%s351_s0 + $0x10] sm:$0xff]  ;;  %v136_v37 = vadd.s32 8, %v135_v34 }
   0x8   :  { %v16_v17 = vld [vmem:[%s351_s0 + $0x8] sm:$0xff]  ;;  %v15_v18 = vld [vmem:[%s351_s0] sm:$0xff]  ;;  %s233_s0 = smov [#allocation2]  }
   0x9   :  { %v31_v19 = vld [vmem:[%s352_s1] sm:$0xff]  ;;  %v32_v20 = vld [vmem:[%s352_s1 + $0x8] sm:$0xff]  ;;  %s158_s1 = sshll.u32 %s233_s0, 4  ;;  %s159_s1 = int_to_ptr.vmem [resolvable:$true] %s158_s1 }
   0xa   :  { %171 = vmatpush.xpose.msk.msra.mxu0 %vm33_vm0, %v28_v2  ;;  %189 = vmatpush.xpose.msk.msra.mxu1 %vm33_vm0, %v28_v2 }
   0xe   :  { %172 = vmatpush.xpose.msk.msra.mxu0 %vm33_vm0, %v27_v3  ;;  %190 = vmatpush.xpose.msk.msra.mxu1 %vm33_vm0, %v27_v3 }
   0xf   :  { %122 = vperm.xlu0 %205, %v112_v11  }
  0x12   :  { %173 = vmatpush.xpose.msk.msra.mxu0 %vm33_vm0, %v26_v4  ;;  %191 = vmatpush.xpose.msk.msra.mxu1 %vm33_vm0, %v26_v4 }
  0x16   :  { %174 = vmatpush.xpose.msk.msra.mxu0 %vm33_vm0, %v25_v5  ;;  %192 = vmatpush.xpose.msk.msra.mxu1 %vm33_vm0, %v25_v5 }
  0x1a   :  { %175 = vmatpush.xpose.msk.msra.mxu0 %vm33_vm0, %v24_v6  ;;  %193 = vmatpush.xpose.msk.msra.mxu1 %vm33_vm0, %v24_v6 }
  0x1e   :  { %176 = vmatpush.xpose.msk.msra.mxu0 %vm33_vm0, %v23_v8  ;;  %194 = vmatpush.xpose.msk.msra.mxu1 %vm33_vm0, %v23_v8 }
  0x22   :  { %177 = vmatpush.xpose.msk.msra.mxu0 %vm33_vm0, %v22_v10  ;;  %195 = vmatpush.xpose.msk.msra.mxu1 %vm33_vm0, %v22_v10 }
  0x26   :  { %178 = vmatpush.xpose.msk.msra.mxu0 %vm33_vm0, %v21_v12  ;;  %196 = vmatpush.xpose.msk.msra.mxu1 %vm33_vm0, %v21_v12 }
  0x2a   :  { %179 = vmatpush.xpose.msk.msra.mxu0 %vm33_vm0, %v20_v13  ;;  %197 = vmatpush.xpose.msk.msra.mxu1 %vm33_vm0, %v20_v13 }
  0x2e   :  { %180 = vmatpush.xpose.msk.msra.mxu0 %vm33_vm0, %v19_v14  ;;  %198 = vmatpush.xpose.msk.msra.mxu1 %vm33_vm0, %v19_v14 }
  0x32   :  { %181 = vmatpush.xpose.msk.msra.mxu0 %vm33_vm0, %v18_v15  ;;  %199 = vmatpush.xpose.msk.msra.mxu1 %vm33_vm0, %v18_v15 }
  0x36   :  { %182 = vmatpush.xpose.msk.msra.mxu0 %vm33_vm0, %v17_v16  ;;  %200 = vmatpush.xpose.msk.msra.mxu1 %vm33_vm0, %v17_v16 }
  0x3a   :  { %183 = vmatpush.xpose.msk.msra.mxu0 %vm33_vm0, %v16_v17  ;;  %201 = vmatpush.xpose.msk.msra.mxu1 %vm33_vm0, %v16_v17 }
  0x3e   :  { %184 = vmatpush.xpose.msk.msra.mxu0 %vm33_vm0, %v15_v18  ;;  %202 = vmatpush.xpose.msk.msra.mxu1 %vm33_vm0, %v15_v18 }
  0x41   :  { %185 = vmatmul.msk.f32.vlgmr.msra.gmra.mxu0 %vm33_vm0, %v31_v19  ;;  %186 = vmatmul.msk.f32.vlgmr.msra.gmra.mxu1 %vm33_vm0, %v32_v20 }
  0x79   :  { %v118_v21 = vpop.permute.xlu0 %117 }
  0x81   :  { %v123_v26 = vpop.permute.xlu0 %122 }
  0xbe   :  { %v105_v22 = vpop.f32.mrf.mxu0  ;;  %v108_v23 = vpop.f32.mrf.mxu1 }
  0xbf   :  { %v113_v24 = vmul.f32 2.0, %v105_v22  ;;  %v114_v25 = vmul.f32 2.0, %v108_v23 }
  0xc1   :  { %v125_v27 = vsub.f32 %v118_v21, %v113_v24  ;;  %v126_v28 = vsub.f32 %v123_v26, %v114_v25 }
  0xc3   :  { %v127_v29 = vmin.f32 %v125_v27, %v126_v28 }
  0xc5   :  { %v128_v30 = vrot.slane %v127_v29, 4 }
  0xc7   :  { %v129_v32 = vmin.f32 %v127_v29, %v128_v30 }
  0xc9   :  { %v130_v33 = vrot.slane %v129_v32, 2 }
  0xcb   :  { %v131_v35 = vmin.f32 %v129_v32, %v130_v33 }
  0xcd   :  { %v132_v36 = vrot.slane %v131_v35, 1 }
  0xcf   :  { %v133_v38 = vmin.f32 %v131_v35, %v132_v36 }
  0xd1   :  { %vm137_vm1 = vcmp.eq.f32.partialorder %v125_v27, %v133_v38  ;;  %vm138_vm2 = vcmp.eq.f32.partialorder %v126_v28, %v133_v38 }
  0xd2   :  { %v139_v39 = vsel %vm137_vm1, %v135_v34, 16  ;;  %v140_v40 = vsel %vm138_vm2, %v136_v37, 16 }
  0xd3   :  { %vm141_vm3 = vcmp.lt.s32.totalorder %v139_v39, %v140_v40 }
  0xd4   :  { %v142_v41 = vsel %vm141_vm3, %v139_v39, %v140_v40 }
  0xd5   :  { %v143_v42 = vrot.slane %v142_v41, 4 }
  0xd7   :  { %vm144_vm4 = vcmp.lt.s32.totalorder %v142_v41, %v143_v42 }
  0xd8   :  { %v145_v43 = vsel %vm144_vm4, %v142_v41, %v143_v42 }
  0xd9   :  { %v146_v44 = vrot.slane %v145_v43, 2 }
  0xdb   :  { %vm147_vm5 = vcmp.lt.s32.totalorder %v145_v43, %v146_v44 }
  0xdc   :  { %v148_v45 = vsel %vm147_vm5, %v145_v43, %v146_v44 }
  0xdd   :  { %v149_v46 = vrot.slane %v148_v45, 1 }
  0xdf   :  { %vm150_vm6 = vcmp.lt.s32.totalorder %v148_v45, %v149_v46 }
  0xe0   :  { %v151_v47 = vsel %vm150_vm6, %v148_v45, %v149_v46 }
  0xe1   :  { %152 = vst [vmem:[#allocation2] sm:$0x1] %v151_v47 }
  0xe2   :  { %163 = dma.vmem_to_hbm [thread:$0]  %s159_s1, 16, %s161_s26, [#allocation3]  }
  0xe3   :  { %230 = dma.done.wait [#allocation3], 16  }
  0xe4   :  { %231 = vsyncadd [#allocation3], 4294967280 }
  0xe5   :  { %168 = vsyncpa [#allocation3], 1 }

</bundles_post_ra>
